<compile_context>
chip_gen: v7x
topology: tpu7x:2x2x1
jax: 0.10.0
libtpu: 0.0.40
codegen_flags: <defaults>
</compile_context>

<pallas_src>
import jax
import jax.numpy as jnp
from jax.experimental import pallas as pl
from jax.experimental.pallas import tpu as pltpu

_SQRT_HALF = 0.7071067811865476  # 1 / sqrt(2)


def _mlp_kernel(x_ref, w1_ref, b1_ref, w2_ref, b2_ref, o_ref, acc_ref):
    j = pl.program_id(1)

    @pl.when(j == 0)
    def _init():
        # Fold the down-projection bias into the accumulator initialization.
        acc_ref[...] = jnp.broadcast_to(
            b2_ref[...].astype(jnp.float32), acc_ref.shape)

    # Up-projection slab: [tm, H] @ [H, ti] (+ b1 slab), f32 accumulation.
    h = jnp.dot(x_ref[...], w1_ref[...], preferred_element_type=jnp.float32)
    h = h + b1_ref[...].astype(jnp.float32)

    # Exact GELU (erf form) — matches torch.nn.GELU() / vLLM get_act_fn("gelu").
    # TODO(synk): if a bundle dump shows VALU saturation on prefill, evaluate
    # the tanh approximation (runs on the EUP slot) against exact-erf numerics.
    h = 0.5 * h * (1.0 + jax.lax.erf(h * _SQRT_HALF))

    # Down-projection partial sum: [tm, ti] @ [ti, H] accumulated in f32.
    acc_ref[...] += jnp.dot(h.astype(w2_ref.dtype), w2_ref[...],
                            preferred_element_type=jnp.float32)

    @pl.when(j == pl.num_programs(1) - 1)
    def _finalize():
        o_ref[...] = acc_ref[...].astype(o_ref.dtype)


def _round_up(x, m):
    return -(-x // m) * m


def _vmem_capacity_and_budget():
    try:
        cap = int(pltpu.get_tpu_info().vmem_capacity_bytes)
    except Exception:
        cap = 64 * 2**20  # conservative default (v7x-sized)
    cap = max(cap, 32 * 2**20)
    # Leave headroom for compiler-internal scratch / semaphores:
    # ~55 MiB usable on v7x (64 MiB), ~110 MiB on v5e/v6e (128 MiB).
    budget = max(24 * 2**20, min(int(cap * 0.86), cap - (6 << 20)))
    return cap, budget


def _choose_tiles(T, H, I, x_bytes, w_bytes, budget, token_tile, inter_tile):
    sublane = max(8, 32 // max(x_bytes, 1))

    def vmem_need(tm, ti):
        return (2 * tm * H * x_bytes        # x tile (double-buffered)
                + 2 * H * ti * w_bytes      # W1 column slab (double-buffered)
                + 2 * ti * H * w_bytes      # W2 row slab (double-buffered)
                + 2 * 8 * ti * w_bytes      # b1 slab (sublane-padded)
                + 2 * 8 * H * w_bytes       # b2 (sublane-padded)
                + 2 * tm * H * x_bytes      # output tile (double-buffered)
                + tm * H * 4)               # f32 accumulator scratch

    # ---- token tile (grid axis 0, "parallel") --------------------------------
    if token_tile is None:
        if T <= 256:
            # Decode / small batch: a single token tile.
            token_tile = _round_up(max(T, 1), sublane)
        else:
            # Prefill: the biggest multiple of 256 that fits the budget with a
            # minimal weight slab, capped so the grid keeps >= 2 token tiles
            # (both v7x TensorCores get work).
            tm = max(256, min(1024, _round_up(pl.cdiv(T, 2), 256)))
            while tm > 256 and vmem_need(tm, 128) > budget:
                tm -= 256
            token_tile = tm
    else:
        token_tile = _round_up(max(token_tile, 1), sublane)

    # ---- intermediate tile (grid axis 1, reduction, "arbitrary") -------------
    I128 = _round_up(I, 128)
    if inter_tile is None:
        # Decode is pure weight streaming: fewer, larger slabs cut per-step
        # grid overhead.  Prefill keeps slabs moderate so token tiles stay big.
        desired = min(I128, 2048 if T <= 256 else 512)
        ti = desired
        while ti > 128 and vmem_need(token_tile, ti) > budget:
            ti -= 128
        ti = max(128, ti)
        # Prefer a tile that divides I exactly (avoids zero-padding weights).
        if I % ti != 0:
            d = ti
            while d >= 128 and I % d != 0:
                d -= 128
            if d >= 128:
                ti = d
        inter_tile = ti
    else:
        inter_tile = min(_round_up(max(inter_tile, 1), 128), I128)

    return token_tile, inter_tile, vmem_need(token_tile, inter_tile)


def gpt_neox_mlp(x, w1, b1, w2, b2, *, token_tile=None, inter_tile=None,
                 vmem_limit_bytes=None):
    """GPT-NeoX MLP forward: gelu(x @ w1 + b1) @ w2 + b2.

    x:  [T, H] activations (tokens already flattened)
    w1: [H, I], b1: [I]   -- dense_h_to_4h (PyTorch weight transposed)
    w2: [I, H], b2: [H]   -- dense_4h_to_h (PyTorch weight transposed)

    For bandwidth-bound serving (decode, especially v5e) pass bf16 w1/w2; the
    kernel always accumulates on the MXU in f32.
    """
    T, H = x.shape
    Hw, I = w1.shape
    assert Hw == H and w2.shape == (I, H) and b1.shape == (I,) and b2.shape == (H,)

    x_bytes = jnp.dtype(x.dtype).itemsize
    w_bytes = jnp.dtype(w1.dtype).itemsize

    cap, budget = _vmem_capacity_and_budget()
    token_tile, inter_tile, need = _choose_tiles(
        T, H, I, x_bytes, w_bytes, budget, token_tile, inter_tile)

    # Zero-pad the intermediate dim so inter_tile divides it exactly.  This is
    # mathematically exact: gelu(x @ 0 + 0) = 0 and 0 @ w2_pad_rows = 0.
    Ip = _round_up(I, inter_tile)
    if Ip != I:
        w1 = jnp.pad(w1, ((0, 0), (0, Ip - I)))
        b1 = jnp.pad(b1, ((0, Ip - I),))
        w2 = jnp.pad(w2, ((0, Ip - I), (0, 0)))

    b1_2d = b1.reshape(1, Ip)
    b2_2d = b2.reshape(1, H)

    # Ragged T is handled by Pallas partial-block masking on the output write
    # (no whole-activation jnp.pad copy per call).  The computation is
    # row-independent, so garbage in out-of-bounds input rows never reaches
    # valid output rows.
    grid = (pl.cdiv(T, token_tile), Ip // inter_tile)

    if vmem_limit_bytes is None:
        vmem_limit_bytes = int(min(cap - (2 << 20),
                                   max(need + (4 << 20), 32 << 20)))

    return pl.pallas_call(
        _mlp_kernel,
        out_shape=jax.ShapeDtypeStruct((T, H), x.dtype),
        grid_spec=pltpu.PrefetchScalarGridSpec(
            num_scalar_prefetch=0,
            grid=grid,
            in_specs=[
                # x and b2 are reduction-invariant (block index constant in j);
                # pipeline_mode=pl.Buffered(1) would single-buffer them and
                # free VMEM on v7x — left at the default for portability (the
                # budget above already charges for the double buffers).
                pl.BlockSpec((token_tile, H), lambda i, j: (i, 0)),   # x tile
                pl.BlockSpec((H, inter_tile), lambda i, j: (0, j)),   # W1 slab
                pl.BlockSpec((1, inter_tile), lambda i, j: (0, j)),   # b1 slab
                pl.BlockSpec((inter_tile, H), lambda i, j: (j, 0)),   # W2 slab
                pl.BlockSpec((1, H), lambda i, j: (0, 0)),            # b2
            ],
            out_specs=pl.BlockSpec((token_tile, H), lambda i, j: (i, 0)),
            scratch_shapes=[pltpu.VMEM((token_tile, H), jnp.float32)],
        ),
        compiler_params=pltpu.CompilerParams(
            dimension_semantics=("parallel", "arbitrary"),
            vmem_limit_bytes=vmem_limit_bytes,
        ),
    )(x, w1, b1_2d, w2, b2_2d)


def gpt_neox_mlp_ref(x, w1, b1, w2, b2):
    h = x @ w1 + b1
    h = 0.5 * h * (1.0 + jax.lax.erf(h * _SQRT_HALF))
    return h @ w2 + b2


if __name__ == "__main__":
    # Small GPT-NeoX-like config: hidden_size=64, intermediate_size=4*64=256,
    # 16 tokens (already flattened to [tokens, hidden]).
    T, H = 16, 64
    I = 4 * H

    key = jax.random.PRNGKey(0)
    kx, k1, kb1, k2, kb2, kx2 = jax.random.split(key, 6)
    x = jax.random.normal(kx, (T, H), dtype=jnp.float32)
    w1 = jax.random.normal(k1, (H, I), dtype=jnp.float32) * 0.02
    b1 = jax.random.normal(kb1, (I,), dtype=jnp.float32) * 0.02
    w2 = jax.random.normal(k2, (I, H), dtype=jnp.float32) * 0.02
    b2 = jax.random.normal(kb2, (H,), dtype=jnp.float32) * 0.02

    ref = gpt_neox_mlp_ref(x, w1, b1, w2, b2)

    # 1) f32, exercising both grid axes (token tiles + intermediate reduction).
    out = jax.block_until_ready(
        gpt_neox_mlp(x, w1, b1, w2, b2, token_tile=8, inter_tile=128))
    assert out.shape == (T, H)
    assert jnp.allclose(out, ref, atol=1e-5, rtol=1e-5), "f32 tiled mismatch"

    # 2) f32, auto-derived (VMEM-budget-aware) tiling.
    out2 = jax.block_until_ready(gpt_neox_mlp(x, w1, b1, w2, b2))
    assert jnp.allclose(out2, ref, atol=1e-5, rtol=1e-5), "f32 default mismatch"

    # 3) bf16 weights/activations (serving path), f32 MXU accumulation.
    out_bf = gpt_neox_mlp(
        x.astype(jnp.bfloat16), w1.astype(jnp.bfloat16), b1.astype(jnp.bfloat16),
        w2.astype(jnp.bfloat16), b2.astype(jnp.bfloat16), inter_tile=128)
    out_bf = jax.block_until_ready(out_bf)
    assert jnp.allclose(out_bf.astype(jnp.float32), ref,
                        atol=3e-2, rtol=3e-2), "bf16 mismatch"

    # 4) Ragged token count (T=20, token_tile=8 -> partial last tile, masked
    #    write) + non-128-multiple intermediate size (I=192 -> exact zero-pad).
    T2, I2 = 20, 192
    xr = jax.random.normal(kx2, (T2, H), dtype=jnp.float32)
    k1b, kb1b, k2b, kb2b = jax.random.split(jax.random.PRNGKey(1), 4)
    w1r = jax.random.normal(k1b, (H, I2), dtype=jnp.float32) * 0.02
    b1r = jax.random.normal(kb1b, (I2,), dtype=jnp.float32) * 0.02
    w2r = jax.random.normal(k2b, (I2, H), dtype=jnp.float32) * 0.02
    b2r = jax.random.normal(kb2b, (H,), dtype=jnp.float32) * 0.02
    refr = gpt_neox_mlp_ref(xr, w1r, b1r, w2r, b2r)
    outr = jax.block_until_ready(
        gpt_neox_mlp(xr, w1r, b1r, w2r, b2r, token_tile=8))
    assert outr.shape == (T2, H)
    assert jnp.allclose(outr, refr, atol=1e-5, rtol=1e-5), "ragged/pad mismatch"

    print("KERNEL_OK")
</pallas_src>

<mosaic_0001>
module attributes {stable_mosaic.version = 11 : i64} {
  func.func @_mlp_kernel(%arg0: i32, %arg1: i32, %arg2: memref<8x64xf32, #tpu.memory_space<vmem>>, %arg3: memref<64x128xf32, #tpu.memory_space<vmem>>, %arg4: memref<1x128xf32, #tpu.memory_space<vmem>>, %arg5: memref<128x64xf32, #tpu.memory_space<vmem>>, %arg6: memref<1x64xf32, #tpu.memory_space<vmem>>, %arg7: memref<8x64xf32, #tpu.memory_space<vmem>>, %arg8: memref<8x64xf32, #tpu.memory_space<vmem>>) attributes {dimension_semantics = [#tpu.dimension_semantics<parallel>, #tpu.dimension_semantics<arbitrary>], iteration_bounds = array<i64: 2, 2>, scalar_prefetch = 0 : i64, scratch_operands = 1 : i64, tpu.core_type = #tpu.core_type<tc>, window_params = [{transform_indices = @transform_0, window_bounds = array<i64: 8, 64>}, {transform_indices = @transform_1, window_bounds = array<i64: 64, 128>}, {transform_indices = @transform_2, window_bounds = array<i64: 1, 128>}, {transform_indices = @transform_3, window_bounds = array<i64: 128, 64>}, {pipeline_mode = #tpu.pipeline_mode<synchronous>, transform_indices = @transform_4, window_bounds = array<i64: 1, 64>}, {transform_indices = @transform_5, window_bounds = array<i64: 8, 64>}]} {
    %c0_i32 = arith.constant 0 : i32
    %0 = arith.cmpi eq, %arg1, %c0_i32 : i32
    %1 = arith.extui %0 : i1 to i32
    %c0_i32_0 = arith.constant 0 : i32
    %2 = arith.cmpi ne, %1, %c0_i32_0 : i32
    scf.if %2 {
      %c0_17 = arith.constant 0 : index
      %c0_18 = arith.constant 0 : index
      %25 = vector.load %arg6[%c0_17, %c0_18] : memref<1x64xf32, #tpu.memory_space<vmem>>, vector<1x64xf32>
      %26 = vector.shape_cast %25 : vector<1x64xf32> to vector<1x64xf32>
      %27 = vector.broadcast %26 : vector<1x64xf32> to vector<8x64xf32>
      %c0_19 = arith.constant 0 : index
      %c0_20 = arith.constant 0 : index
      %28 = vector.load %arg8[%c0_19, %c0_20] : memref<8x64xf32, #tpu.memory_space<vmem>>, vector<8x64xf32>
      tpu.vector_store %arg8[%c0_19, %c0_20], %27 {strides = array<i32>} : memref<8x64xf32, #tpu.memory_space<vmem>>, vector<8x64xf32>,
    } else {
    }
    %c0 = arith.constant 0 : index
    %c0_1 = arith.constant 0 : index
    %3 = vector.load %arg2[%c0, %c0_1] : memref<8x64xf32, #tpu.memory_space<vmem>>, vector<8x64xf32>
    %c0_2 = arith.constant 0 : index
    %c0_3 = arith.constant 0 : index
    %4 = vector.load %arg3[%c0_2, %c0_3] : memref<64x128xf32, #tpu.memory_space<vmem>>, vector<64x128xf32>
    %cst = arith.constant dense<0.000000e+00> : vector<8x128xf32>
    %5 = tpu.matmul %3, %4, %cst {dimension_numbers = #tpu.dot_dimension_numbers<[1], [0], [0], [1], [0, 0, 1, 1], [], []>} : vector<8x64xf32>, vector<64x128xf32>, vector<8x128xf32> -> vector<8x128xf32>
    %c0_4 = arith.constant 0 : index
    %c0_5 = arith.constant 0 : index
    %6 = vector.load %arg4[%c0_4, %c0_5] : memref<1x128xf32, #tpu.memory_space<vmem>>, vector<1x128xf32>
    %7 = vector.broadcast %6 : vector<1x128xf32> to vector<8x128xf32>
    %8 = arith.addf %5, %7 : vector<8x128xf32>
    %cst_6 = arith.constant 5.000000e-01 : f32
    %9 = vector.broadcast %cst_6 : f32 to vector<8x128xf32>
    %10 = arith.mulf %9, %8 : vector<8x128xf32>
    %cst_7 = arith.constant 0.707106769 : f32
    %11 = vector.broadcast %cst_7 : f32 to vector<8x128xf32>
    %12 = arith.mulf %8, %11 : vector<8x128xf32>
    %13 = math.erf %12 : vector<8x128xf32>
    %cst_8 = arith.constant 1.000000e+00 : f32
    %14 = vector.broadcast %cst_8 : f32 to vector<8x128xf32>
    %15 = arith.addf %14, %13 : vector<8x128xf32>
    %16 = arith.mulf %10, %15 : vector<8x128xf32>
    %c0_9 = arith.constant 0 : index
    %c0_10 = arith.constant 0 : index
    %17 = vector.load %arg8[%c0_9, %c0_10] : memref<8x64xf32, #tpu.memory_space<vmem>>, vector<8x64xf32>
    %c0_11 = arith.constant 0 : index
    %c0_12 = arith.constant 0 : index
    %18 = vector.load %arg5[%c0_11, %c0_12] : memref<128x64xf32, #tpu.memory_space<vmem>>, vector<128x64xf32>
    %cst_13 = arith.constant dense<0.000000e+00> : vector<8x64xf32>
    %19 = tpu.matmul %16, %18, %cst_13 {dimension_numbers = #tpu.dot_dimension_numbers<[1], [0], [0], [1], [0, 0, 1, 1], [], []>} : vector<8x128xf32>, vector<128x64xf32>, vector<8x64xf32> -> vector<8x64xf32>
    %20 = arith.addf %17, %19 : vector<8x64xf32>
    %c0_14 = arith.constant 0 : index
    %c0_15 = arith.constant 0 : index
    %21 = vector.load %arg8[%c0_14, %c0_15] : memref<8x64xf32, #tpu.memory_space<vmem>>, vector<8x64xf32>
    tpu.vector_store %arg8[%c0_14, %c0_15], %20 {strides = array<i32>} : memref<8x64xf32, #tpu.memory_space<vmem>>, vector<8x64xf32>,
    %c1_i32 = arith.constant 1 : i32
    %22 = arith.cmpi eq, %arg1, %c1_i32 : i32
    %23 = arith.extui %22 : i1 to i32
    %c0_i32_16 = arith.constant 0 : i32
    %24 = arith.cmpi ne, %23, %c0_i32_16 : i32
    scf.if %24 {
      %c0_17 = arith.constant 0 : index
      %c0_18 = arith.constant 0 : index
      %25 = vector.load %arg8[%c0_17, %c0_18] : memref<8x64xf32, #tpu.memory_space<vmem>>, vector<8x64xf32>
      %c0_19 = arith.constant 0 : index
      %c0_20 = arith.constant 0 : index
      %26 = vector.load %arg7[%c0_19, %c0_20] : memref<8x64xf32, #tpu.memory_space<vmem>>, vector<8x64xf32>
      tpu.vector_store %arg7[%c0_19, %c0_20], %25 {strides = array<i32>} : memref<8x64xf32, #tpu.memory_space<vmem>>, vector<8x64xf32>,
    } else {
    }
    return
  }
  func.func @transform_0(%arg0: i32, %arg1: i32) -> (i32, i32) {
    %c0_i32 = arith.constant 0 : i32
    %c0_i32_0 = arith.constant 0 : i32
    return %arg0, %c0_i32 : i32, i32
  }
  func.func @transform_1(%arg0: i32, %arg1: i32) -> (i32, i32) {
    %c0_i32 = arith.constant 0 : i32
    %c0_i32_0 = arith.constant 0 : i32
    return %c0_i32, %arg1 : i32, i32
  }
  func.func @transform_2(%arg0: i32, %arg1: i32) -> (i32, i32) {
    %c0_i32 = arith.constant 0 : i32
    %c0_i32_0 = arith.constant 0 : i32
    return %c0_i32, %arg1 : i32, i32
  }
  func.func @transform_3(%arg0: i32, %arg1: i32) -> (i32, i32) {
    %c0_i32 = arith.constant 0 : i32
    %c0_i32_0 = arith.constant 0 : i32
    return %arg1, %c0_i32 : i32, i32
  }
  func.func @transform_4(%arg0: i32, %arg1: i32) -> (i32, i32) {
    %c0_i32 = arith.constant 0 : i32
    %c0_i32_0 = arith.constant 0 : i32
    %c0_i32_1 = arith.constant 0 : i32
    return %c0_i32, %c0_i32_0 : i32, i32
  }
  func.func @transform_5(%arg0: i32, %arg1: i32) -> (i32, i32) {
    %c0_i32 = arith.constant 0 : i32
    %c0_i32_0 = arith.constant 0 : i32
    return %arg0, %c0_i32 : i32, i32
  }
}

</mosaic_0001>

<bundles_post_ra>
// kernel: tpu_custom_call.1
= control target key start
LH: loop header
LB: loop body
LE: loop exit
PB: predicated region body
PF: predicated region fallthrough
CT: control target
= control target key end

     0   :  { %s1282_s0 = inlined_call_operand.vmem [shape: f32[16,64], index: 0, kind: input, shape index: {}]   ;;  %s1283_s1 = inlined_call_operand.vmem [shape: f32[64,256], index: 1, kind: input, shape index: {}]   ;;  %s1284_s2 = inlined_call_operand.vmem [shape: f32[1,256], index: 2, kind: input, shape index: {}]   ;;  %s1285_s3 = inlined_call_operand.vmem [shape: f32[256,64], index: 3, kind: input, shape index: {}]   ;;  %s1286_s4 = inlined_call_operand.vmem [shape: f32[1,64], index: 4, kind: input, shape index: {}]   ;;  %s1287_s5 = inlined_call_operand.hbm [shape: f32[16,64], index: 5, kind: output, shape index: {}]  }
   0x1   :  { %1294 = sst [smem:[#allocation13_spill]] %s1283_s1 }
   0x2   :  { %10 = vsyncpa [#allocation5], 0 }
   0x3   :  { %12 = vsyncpa [#allocation5 + $0x1], 0  ;;  %s1051_s18 = smov 0   ;;  %s1053_s19 = smov 0  }
   0x4   :  { %s1055_s20 = smov 0   ;;  %s1057_s21 = smov 0  }
   0x5   :  { %s1059_s22 = smov 0   ;;  %s1061_s23 = smov 0  }
   0x6   :  { %s1063_s24 = smov 0   ;;  %s1065_s25 = smov 0  }
   0x7   :  { %s1067_s26 = smov 0   ;;  %s1069_s27 = smov 0  }
   0x8 LB: > { %1295 = sst [smem:[#allocation7_spill]] %s995_s22  ;;  %s676_s28 = sadd.s32 4294967295, %s1015_s27   ;;  %s1015_s27 = sphi %s1069_s27, %s18_s27   ;;  %s1011_s26 = sphi %s1067_s26, %s1311_s26   ;;  %s1007_s25 = sphi %s1065_s25, %s1310_s25   ;;  %s1003_s24 = sphi %s1063_s24, %s1309_s24   ;;  %s999_s23 = sphi %s1061_s23, %s1308_s23   ;;  %s995_s22 = sphi %s1059_s22, %s1307_s22   ;;  %s991_s21 = sphi %s1057_s21, %s1306_s21   ;;  %s987_s20 = sphi %s1055_s20, %s1314_s20   ;;  %s983_s19 = sphi %s1053_s19, %s1313_s19   ;;  %s979_s18 = sphi %s1051_s18, %s1312_s18  }
   0x9   : > { %1296 = sst [smem:[#allocation8_spill]] %s1007_s25  ;;  %s677_s29 = sadd.s32 4294967294, %s1015_s27  }
   0xa   : > { %1297 = sst [smem:[#allocation9_spill]] %s1011_s26  ;;  %s27_s30 = sadd.s32 1, %s1007_s25 }
   0xb   : > { %s30_s6 = sadd.s32 1, %s1011_s26  ;;  %p28_p0 = scmp.ge.s32.totalorder %s27_s30, 2 }
   0xc   : > { %s63_s7 = sadd.s32 1, %s995_s22  ;;  %p70_p1 = scmp.ne.s32.totalorder %s995_s22, %s991_s21 }
   0xd   : > { %p71_p2 = scmp.eq.s32.totalorder %s1015_s27, 0  ;;  %s1316_s30 = smov (%p28_p0, %s27_s30), 0 }
   0xe   : > { %1298 = sst [smem:[#allocation10_spill]] %s1316_s30  ;;  %s1318_s6 = smov (!%p28_p0, %s30_s6), %s1011_s26 }
   0xf   : > { %s60_s8 = ssub.s32 %s1007_s25, %s1316_s30  ;;  %p1114_p3 = por %p71_p2, %p70_p1 }
  0x10   : > { %p32_p4 = scmp.ge.s32.totalorder %s1318_s6, 2  ;;  %p61_p5 = scmp.eq.s32.totalorder %s60_s8, 0 }
  0x11   : > { %s162_s10 = sadd.s32 1, %s987_s20  ;;  %p172_p6 = scmp.ne.s32.totalorder %s987_s20, %s983_s19 }
  0x12   : > { %s1320_s6 = smov (%p32_p4, %s1318_s6), 0  ;;  %p173_p7 = scmp.eq.s32.totalorder %s676_s28, 3 }
  0x13   : > { %1300 = sst [smem:[#allocation11_spill]] %s1320_s6  ;;  %s159_s12 = ssub.s32 %s1011_s26, %s1320_s6 }
  0x14   : > { %s1124_s11 = scalar_select %p61_p5, %s995_s22, %s63_s7  }
  0x15   : > { %p160_p8 = scmp.eq.s32.totalorder %s159_s12, 0  ;;  %p178_p9 = scmp.ne.s32.totalorder %s983_s19, %s979_s18 }
  0x16   : > { %1301 = sst [smem:[#allocation12_spill]] %s1124_s11  ;;  %p1130_p10 = por %p173_p7, %p172_p6 }
  0x17   : > { %p179_p11 = scmp.eq.s32.totalorder %s677_s29, 3  ;;  %p679_p13 = scmp.ge.s32.totalorder %s1015_s27, 4 }
  0x18   : > { %s1135_s14 = scalar_select %p160_p8, %s987_s20, %s162_s10  }
  0x19   : > { %p1137_p12 = por %p179_p11, %p178_p9  ;;  %198 = sbr.rel (%p679_p13) target bundleno = 46 (0x2e), region = 20 }
  0x20   : > { %208 = sbr.rel (!%p1114_p3) target bundleno = 46 (0x2e), region = 28  ;;  %s210_s16 = sand.u32 (%p1114_p3), 1, %s995_s22  }
  0x21   : > { %s681_s17 = sshll.u32 (%p1114_p3), %s1007_s25, 3  ;;  %s680_s28 = sshll.u32 (%p1114_p3), %s210_s16, 6 }
  0x22   : > { %s1304_s1 = sld [smem:[#allocation13_spill]] (%p1114_p3)  ;;  %s212_s10 = scalar_lea.vmem (%p1114_p3), [#allocation3], %s680_s28 }
  0x28   : > { %s214_s29 = scalar_lea.vmem %s1304_s1, %s681_s17 }
  0x29   : > { %v256_v0 = vld [vmem:[%s214_s29] sm:$0xff]  ;;  %v258_v1 = vld [vmem:[%s214_s29 + $0x10] sm:$0xff] }
  0x2a   : > { %v260_v2 = vld [vmem:[%s214_s29 + $0x20] sm:$0xff]  ;;  %257 = vst [vmem:[%s212_s10] sm:$0xff] %v256_v0  ;;  %259 = vst [vmem:[%s212_s10 + $0x8] sm:$0xff] %v258_v1  ;;  %v262_v3 = vld [vmem:[%s214_s29 + $0x30] sm:$0xff] }
  0x2b   : > { %261 = vst [vmem:[%s212_s10 + $0x10] sm:$0xff] %v260_v2  ;;  %v264_v4 = vld [vmem:[%s214_s29 + $0x40] sm:$0xff]  ;;  %v266_v5 = vld [vmem:[%s214_s29 + $0x50] sm:$0xff]  ;;  %263 = vst [vmem:[%s212_s10 + $0x18] sm:$0xff] %v262_v3 }
  0x2c   : > { %265 = vst [vmem:[%s212_s10 + $0x20] sm:$0xff] %v264_v4  ;;  %267 = vst [vmem:[%s212_s10 + $0x28] sm:$0xff] %v266_v5  ;;  %v268_v6 = vld [vmem:[%s214_s29 + $0x60] sm:$0xff]  ;;  %v270_v7 = vld [vmem:[%s214_s29 + $0x70] sm:$0xff] }
  0x2d   : > { %269 = vst [vmem:[%s212_s10 + $0x30] sm:$0xff] %v268_v6  ;;  %271 = vst [vmem:[%s212_s10 + $0x38] sm:$0xff] %v270_v7 }
  0x2e PF: > { %p682_p0 = scmp.ge.s32.totalorder %s1015_s27, 1  ;;  %p291_p1 = scmp.lt.s32.totalorder %s1015_s27, 5 }
  0x30   : > { %p292_p2 = pnand %p682_p0, %p291_p1 }
  0x31   : > { %s298_s9 = sand.u32 (!%p292_p2), 1, %s991_s21   ;;  %s1289_s12 = sand.u32 (!%p292_p2), 1, %s983_s19  }
  0x32   : > { %295 = sbr.rel (%p292_p2) target bundleno = 566 (0x236), region = 74  ;;  %s683_s16 = sshll.u32 (!%p292_p2), %s298_s9, 6 }
  0x33   : > { %s1155_s17 = sshll.u32 (!%p292_p2), %s1289_s12, 3  ;;  %p337_p3 = scmp.lt.s32.totalorder (!%p292_p2), %s1003_s24, 1 }
  0x34   : > { %p341_p4 = scmp.lt.s32.totalorder (!%p292_p2), %s999_s23, 1  ;;  %s686_s28 = sshll.u32 (!%p292_p2), %s999_s23, 4 }
  0x35   : > { %p345_p5 = scmp.lt.s32.totalorder (!%p292_p2), %s686_s28, 31  ;;  %s1178_s22 = scalar_lea.vmem (!%p292_p2), [#allocation3], %s683_s16 }
  0x36   : > { %p688_p6 = scmp.ne.s32.totalorder (!%p292_p2), %s999_s23, 0 }
  0x39   : > { %s338_s7 = scalar_select %p337_p3, %s1003_s24, 1 }
  0x3a   : > { %s1162_s8 = scalar_select %p341_p4, %s999_s23, 1 }
  0x3b   : > { %s685_s29 = sshll.u32 %s338_s7, 3  ;;  %s1322_s28 = smov (!%p345_p5, %s686_s28), 31  ;;  %v689_v8 = vld [vmem:[%s1286_s4] ss:$0 sm:$0xff] (!%p688_p6)  ;;  %vm361_vm0 = vcmask (!%p688_p6), 523264  }
  0x3c   : > { %s1167_s6 = scalar_lea.vmem %s1282_s0, %s685_s29  ;;  %s343_s12 = scalar_lea.vmem %s1284_s2, %s1162_s8  ;;  %362 = vst.msk [vmem:[#allocation2] sm:$0xff] (!%p688_p6), %vm361_vm0, %v689_v8 }
  0x3d   : > { %s687_s30 = sshll.u32 %s1322_s28, 3  ;;  %s336_s7 = scalar_lea.vmem [#allocation4], %s1155_s17 }
  0x3e   : > { %s1176_s11 = scalar_lea.vmem %s1285_s3, %s687_s30  ;;  %353 = sbr.rel (%p688_p6) target bundleno = 69 (0x45), region = 82 }
  0x45 PF: > { %v364_v9 = vld [vmem:[%s1178_s22] sm:$0xff]  ;;  %v365_v10 = vld [vmem:[%s1178_s22 + $0x8] sm:$0xff]  ;;  %v366_v11 = vld [vmem:[%s1178_s22 + $0x10] sm:$0xff]  ;;  %v1017_v12 = vmov 0.0|0.0   ;;  %vm1018_vm1 = vmmov 0   ;;  %v1019_v15 = vmov 0.0  }
  0x46   : > { %777 = vmatprep.subr.bf16.mxu0 %v1017_v12  ;;  %v778_v13 = vpack.c.bf16 %v365_v10, %v364_v9  ;;  %v367_v14 = vld [vmem:[%s1178_s22 + $0x18] sm:$0xff]  ;;  %739 = vmatprep.mubr.msk.f32.mxu0 %vm1018_vm1, %v1019_v15  ;;  %v460_v18 = vld [vmem:[%s1176_s11 + $0x8] sm:$0xff]  ;;  %v461_v19 = vld [vmem:[%s1176_s11 + $0x10] sm:$0xff]  ;;  %vm379_vm2 = vcmask 523264   ;;  %p692_p7 = scmp.ne.s32.totalorder %s999_s23, 1 }
  0x47   : > { %789 = vmatprep.subr.bf16.mxu1 %v1017_v12  ;;  %774 = vmatprep.mubr.msk.f32.mxu1 %vm1018_vm1, %v1019_v15  ;;  %v781_v16 = vpack.c.bf16 %v367_v14, %v366_v11  ;;  %v459_v17 = vld [vmem:[%s1176_s11] sm:$0xff]  ;;  %v368_v20 = vld [vmem:[%s1178_s22 + $0x20] sm:$0xff]  ;;  %v369_v21 = vld [vmem:[%s1178_s22 + $0x28] sm:$0xff] }
  0x48   : > { %779 = vmatpush3.bf16.msra.mxu0 %v778_v13  ;;  %v790_v22 = vpack.c.bf16 %v460_v18, %v459_v17  ;;  %v462_v23 = vld [vmem:[%s1176_s11 + $0x18] sm:$0xff]  ;;  %v784_v25 = vpack.c.bf16 %v369_v21, %v368_v20  ;;  %v463_v26 = vld [vmem:[%s1176_s11 + $0x20] sm:$0xff]  ;;  %v464_v27 = vld [vmem:[%s1176_s11 + $0x28] sm:$0xff] }
  0x49   : > { %780 = vmatprep.subr.bf16.mxu0 %v1017_v12  ;;  %v793_v24 = vpack.c.bf16 %v462_v23, %v461_v19  ;;  %v370_v28 = vld [vmem:[%s1178_s22 + $0x30] sm:$0xff]  ;;  %v371_v29 = vld [vmem:[%s1178_s22 + $0x38] sm:$0xff]  ;;  %v796_v30 = vpack.c.bf16 %v464_v27, %v463_v26  ;;  %v465_v33 = vld [vmem:[%s1176_s11 + $0x30] sm:$0xff] }
  0x4a   : > { %791 = vmatpush3.bf16.msra.mxu1 %v790_v22  ;;  %v787_v31 = vpack.c.bf16 %v371_v29, %v370_v28  ;;  %v363_v32 = vld [vmem:[%s1167_s6] sm:$0xff]  ;;  %v466_v34 = vld [vmem:[%s1176_s11 + $0x38] sm:$0xff]  ;;  %v468_v37 = vld [vmem:[%s1176_s11 + $0x48] sm:$0xff] }
  0x4b   : > { %792 = vmatprep.subr.bf16.mxu1 %v1017_v12  ;;  %v799_v35 = vpack.c.bf16 %v466_v34, %v465_v33  ;;  %v467_v36 = vld [vmem:[%s1176_s11 + $0x40] sm:$0xff]  ;;  %v469_v39 = vld [vmem:[%s1176_s11 + $0x50] sm:$0xff]  ;;  %v470_v40 = vld [vmem:[%s1176_s11 + $0x58] sm:$0xff] }
  0x4c   : > { %782 = vmatpush3.bf16.msra.mxu0 %v781_v16  ;;  %v802_v38 = vpack.c.bf16 %v468_v37, %v467_v36  ;;  %v805_v41 = vpack.c.bf16 %v470_v40, %v469_v39  ;;  %v471_v42 = vld [vmem:[%s1176_s11 + $0x60] sm:$0xff]  ;;  %v472_v43 = vld [vmem:[%s1176_s11 + $0x68] sm:$0xff]  ;;  %v473_v45 = vld [vmem:[%s1176_s11 + $0x70] sm:$0xff] }
  0x4d   : > { %783 = vmatprep.subr.bf16.mxu0 %v1017_v12  ;;  %v808_v44 = vpack.c.bf16 %v472_v43, %v471_v42  ;;  %v474_v46 = vld [vmem:[%s1176_s11 + $0x78] sm:$0xff]  ;;  %v690_v48 = vld [vmem:[%s343_s12] ss:$0 sm:$0xff] }
  0x4e   : > { %794 = vmatpush3.bf16.msra.mxu1 %v793_v24  ;;  %v811_v47 = vpack.c.bf16 %v474_v46, %v473_v45  ;;  %v458_v57 = vld [vmem:[#allocation2] sm:$0xff] }
  0x4f   : > { %795 = vmatprep.subr.bf16.mxu1 %v1017_v12 }
  0x50   : > { %785 = vmatpush3.bf16.msra.mxu0 %v784_v25 }
  0x51   : > { %786 = vmatprep.subr.bf16.mxu0 %v1017_v12 }
  0x52   : > { %797 = vmatpush3.bf16.msra.mxu1 %v796_v30 }
  0x53   : > { %798 = vmatprep.subr.bf16.mxu1 %v1017_v12 }
  0x54   : > { %788 = vmatpush3.bf16.msra.mxu0 %v787_v31 }
  0x56   : > { %800 = vmatpush3.bf16.msra.mxu1 %v799_v35 }
  0x57   : > { %740 = vmatmul.mubr.msk.f32.vlgmr.msra.gmra.mrb[0].mxu0 %vm379_vm2, %v363_v32  ;;  %801 = vmatprep.subr.bf16.mxu1 %v1017_v12 }
  0x5a   : > { %803 = vmatpush3.bf16.msra.mxu1 %v802_v38 }
  0x5b   : > { %804 = vmatprep.subr.bf16.mxu1 %v1017_v12 }
  0x5e   : > { %806 = vmatpush3.bf16.msra.mxu1 %v805_v41 }
  0x5f   : > { %807 = vmatprep.subr.bf16.mxu1 %v1017_v12 }
  0x62   : > { %809 = vmatpush3.bf16.msra.mxu1 %v808_v44 }
  0x63   : > { %810 = vmatprep.subr.bf16.mxu1 %v1017_v12 }
  0x66   : > { %812 = vmatpush3.bf16.msra.mxu1 %v811_v47 }
 0x12a   : > { %v449_v49 = vpop.f32.mrb[0].mxu0 }
 0x12b   : > { %v450_v50 = vadd.f32 %v690_v48, %v449_v49  ;;  %v741_v51 = vpop.f32.mrb[1].mxu0 }
 0x12d   : > { %v454_v52 = vmul.f32 0.70710677, %v450_v50  ;;  %v453_v54 = vmul.f32 0.5, %v450_v50 }
 0x12f   : > { %903 = verf.f32 %v454_v52 }
 0x139   : > { %v904_v53 = vpop.eup %903 }
 0x13a   : > { %v456_v55 = vadd.f32 1.0, %v904_v53 }
 0x13c   : > { %v457_v56 = vmul.f32 %v456_v55, %v453_v54 }
 0x13e   : > { %775 = vmatmul.mubr.f32.vlgmr.msra.gmra.mrb[0].mxu1 %v457_v56 }
 0x20e   : > { %550 = sbr.rel (%p692_p7) target bundleno = 541 (0x21d), region = 86 }
 0x211   : > { %v541_v58 = vpop.f32.mrb[0].mxu1 }
 0x212   : > { %v545_v59 = vadd.f32 %v541_v58, %v458_v57  ;;  %v776_v60 = vpop.f32.mrb[1].mxu1 }
 0x214   : > { %546 = vst.msk [vmem:[#allocation2] sm:$0xff] %vm379_vm2, %v545_v59 }
 0x21b   : > { %v551_v61 = vld [vmem:[#allocation2] sm:$0xff] }
 0x21c   : > { %552 = vst.msk [vmem:[%s336_s7] sm:$0xff] %vm379_vm2, %v551_v61 }
 0x21d PF: > { %s694_s26 = sshll.u32 %s1003_s24, 7  ;;  %s567_s12 = sshll.u32 %s336_s7, 4  ;;  %s568_s12 = int_to_ptr.vmem [resolvable:$true] %s567_s12 }
 0x21e   : > { %s1225_s11 = scalar_lea.hbm %s1287_s5, %s694_s26  ;;  %s1305_s23 = sand.u32 1, %s983_s19  }
 0x21f   : > { %s554_s16 = scalar_lea.sflag [#allocation5], %s1305_s23  ;;  %s905_s28 = scalar_lea.vmem %s568_s12, 128 }
 0x220   : > { %p906_p8 = scmp.ne.s32.totalorder %s568_s12, %s905_s28  ;;  %s1020_s8 = smov [#allocation4]  }
 0x221   : > { %s909_s10 = sshll.u32 %s1020_s8, 4  ;;  %s910_s10 = int_to_ptr.vmem [resolvable:$false] %s909_s10 }
 0x222   : > { %p907_p9 = pnand %p906_p8, %p1130_p10  ;;  %s911_s21 = scalar_lea.vmem %s910_s10, 256 }
 0x223   : > { %p912_p13 = scmp.lt.s32.totalorder %s568_s12, %s910_s10  ;;  %p913_p0 = scmp.lt.s32.totalorder %s911_s21, %s905_s28 }
 0x224   : > { %p908_p11 = pneg %p907_p9 }
 0x225   : > { %p914_p1 = por %p913_p0, %p912_p13 }
 0x227   : > { %p915_p2 = pnand %p914_p1, %p908_p11 }
 0x229   : > { %918 = shalt.err (!%p915_p2)
}
 0x22a   : > { %s919_s24 = scalar_lea.hbm %s1225_s11, 128  ;;  %s923_s7 = scalar_lea.hbm %s1287_s5, 256 }
 0x22b   : > { %p920_p3 = scmp.ne.s32.totalorder %s1225_s11, %s919_s24  ;;  %p924_p6 = scmp.lt.u32.totalorder %s1225_s11, %s1287_s5 }
 0x22c   : > { %p925_p7 = scmp.lt.u32.totalorder %s923_s7, %s919_s24  ;;  %p927_p9 = scmp.lt.u32.totalorder %s919_s24, %s1225_s11 }
 0x22d   : > { %p921_p4 = pnand %p920_p3, %p1130_p10 }
 0x22e   : > { %p926_p8 = por %p925_p7, %p924_p6 }
 0x22f   : > { %p922_p5 = pneg %p921_p4 }
 0x230   : > { %p928_p11 = por %p927_p9, %p926_p8 }
 0x232   : > { %p929_p13 = pnand %p928_p11, %p922_p5 }
 0x234   : > { %932 = shalt.err (!%p929_p13)
}
 0x235   : > { %813 = dma.vmem_to_hbm [thread:$0]  (%p1130_p10), %s568_s12, 128, %s1225_s11, %s554_s16  }
 0x236 PF: > { %p819_p0 = scmp.ge.s32.totalorder %s1015_s27, 2  ;;  %s579_s22 = sand.u32 1, %s979_s18  }
 0x237   : > { %s580_s25 = scalar_lea.sflag [#allocation5], %s579_s22 }
 0x238   : > { %p816_p1 = pnand %p819_p0, %p1137_p12 }
 0x23a   : > { %974 = dma.done.wait (!%p816_p1), %s580_s25, 128  }
 0x23b   : > { %976 = vsyncadd (!%p816_p1), %s580_s25, 4294967168  ;;  %s18_s27 = sadd.s32 1, %s1015_s27   ;;  %s1306_s21 = sld [smem:[#allocation7_spill]] }
 0x23c   : > { %p15_p2 = scmp.ge.s32.totalorder %s18_s27, 6   ;;  %s1307_s22 = sld [smem:[#allocation12_spill]] }
 0x23d   : > { %s1308_s23 = sld [smem:[#allocation8_spill]]  ;;  %s1309_s24 = sld [smem:[#allocation9_spill]] }
 0x23e   : > { %s1310_s25 = sld [smem:[#allocation10_spill]]  ;;  %s1311_s26 = sld [smem:[#allocation11_spill]] }
 0x23f   : > { %s1312_s18 = smov %s983_s19  ;;  %s1313_s19 = smov %s987_s20 }
 0x240   : > { %s1314_s20 = smov %s1135_s14  ;;  %17 = sbr.rel (!%p15_p2) target bundleno = 8 (0x8), region = 135 }
 0x247   :  { %585 = vsyncpa [#allocation5], 1 }
 0x248   :  { %587 = vsyncpa [#allocation5 + $0x1], 1 }

</bundles_post_ra>
